<compile_context>
chip_gen: v5e
topology: v5e:2x2
jax: 0.10.0
libtpu: 0.0.40
codegen_flags: <defaults>
</compile_context>

<pallas_src>
import jax
import jax.numpy as jnp
from jax.experimental import pallas as pl
from jax.experimental.pallas import tpu as pltpu


def _round_up(x: int, m: int) -> int:
    return ((x + m - 1) // m) * m


def _seqwise_linear_kernel(x_ref, w_ref, b_ref, o_ref):
    # x_ref: (TM, F), w_ref: (F, Hp), b_ref: (1, Hp) f32, o_ref: (TM, Hp)
    acc = jnp.dot(x_ref[...], w_ref[...], preferred_element_type=jnp.float32)
    # Bias add in f32 (VPU); v5e has no bf16 VPU path, so never do bf16
    # elementwise math here.  Cast once on the way out.
    o_ref[...] = (acc + b_ref[...]).astype(o_ref.dtype)


def prepare_sequence_wise_params(weight, bias, lane: int = 128,
                                 param_dtype=None):
    """One-time parameter prep (do NOT call per forward pass).

    weight: (H, F) in the PyTorch nn.Linear convention.
    bias:   (H,)
    Returns (w_fh, b2d, H): weight transposed to (F, Hp) and bias as (1, Hp)
    float32, zero-padded so Hp is a multiple of `lane` (lane-dense full-width
    vst stores).  Padding is skipped entirely when H is already lane-aligned.
    param_dtype=jnp.bfloat16 casts the weight for the bf16 MXU path; the bias
    stays f32.  (Optional: pass lane=256 on v6e/v7x for awkward H in the
    129..255 (mod 256) range to keep the 2x256^2 MXU passes full-width.)
    """
    H, F = weight.shape
    Hp = H if H % lane == 0 else _round_up(H, lane)
    w_fh = jnp.asarray(weight).T                  # transpose once, not per call
    b = jnp.asarray(bias, dtype=jnp.float32)
    if Hp != H:
        w_fh = jnp.pad(w_fh, ((0, 0), (0, Hp - H)))
        b = jnp.pad(b, (0, Hp - H))
    if param_dtype is not None:
        w_fh = w_fh.astype(param_dtype)
    return w_fh, b.reshape(1, Hp), H


def sequence_wise_linear(x, w_fh, b2d, out_features, *,
                         compute_dtype=None, keep_lane_padding=False):
    """SequenceWise(Linear) forward: (T, N, F) -> (T, N, out_features).

    x:             (T, N, F) time-major, same as the PyTorch module.
    w_fh, b2d:     prepared by prepare_sequence_wise_params().
    out_features:  true H (before lane padding).
    compute_dtype: optional (e.g. jnp.bfloat16) cast of the activation
                   stream; accumulation stays f32.
    keep_lane_padding: return the padded (T, N, Hp) layout and skip the
                   unpad slice pass (an extra full HBM read/write of the
                   output) when the consumer tolerates it.
    """
    T, N, F = x.shape
    Fw, Hp = w_fh.shape
    assert Fw == F, (Fw, F)
    M = T * N

    x2d = x.reshape(M, F)                          # x.view(t * n, -1): free
    if compute_dtype is not None and x2d.dtype != compute_dtype:
        x2d = x2d.astype(compute_dtype)
    out_dtype = x2d.dtype

    in_item = jnp.dtype(x2d.dtype).itemsize
    out_item = jnp.dtype(out_dtype).itemsize
    w_item = jnp.dtype(w_fh.dtype).itemsize

    # ---- Row-tile sizing ----------------------------------------------------
    # Target a few MiB of x+out traffic per grid step so the ~0.35 us/step
    # pipeline overhead is amortized (measured sweeps: multi-MiB tiles reach
    # ~85% of HBM roofline), rounded to the dtype's sublane packing and capped
    # by the (sublane-rounded) number of rows actually present.
    sublane = max(8, 32 // in_item)                # 8 f32 / 16 bf16 / 32 int8
    target_tile_bytes = 4 * 1024 * 1024
    tm = target_tile_bytes // max(1, F * in_item + Hp * out_item)
    tm = max(512, min(int(tm), 4096))
    tm = (tm // sublane) * sublane
    TM = min(tm, _round_up(M, sublane))

    # Ragged last block (M % TM != 0): OOB rows read unspecified data that
    # only lands in output rows Pallas never writes back.  Safe because rows
    # are independent; do NOT add cross-row reductions without masking.
    grid = (pl.cdiv(M, TM),)

    # ---- VMEM budget ---------------------------------------------------------
    # Double-buffered x/out tiles + weight & bias.  The weight is counted
    # twice so the limit stays sufficient even if the single-buffer request
    # below is ignored and Pallas double-buffers it.
    vmem_need = (2 * TM * F * in_item + 2 * TM * Hp * out_item
                 + 2 * F * Hp * w_item + 2 * Hp * 4)
    try:
        phys_vmem = int(pltpu.get_tpu_info().vmem_capacity_bytes)
    except Exception:
        phys_vmem = 64 * 1024 * 1024               # conservative: v7x per-TC
    vmem_cap = (phys_vmem * 3) // 4                # headroom for Mosaic scratch
    vmem_limit = int(min(max(2 * vmem_need, 16 * 1024 * 1024), vmem_cap))

    cost = pl.CostEstimate(
        flops=2 * M * F * Hp,
        transcendentals=0,
        bytes_accessed=M * F * in_item + F * Hp * w_item + M * Hp * out_item,
    )

    def run(single_buffer_params: bool):
        if single_buffer_params:
            # Constant index_map -> weight/bias are DMA'd exactly once; a
            # single buffer halves their resident VMEM footprint.
            w_spec = pl.BlockSpec((F, Hp), lambda i: (0, 0),
                                  pipeline_mode=pl.Buffered(1))
            b_spec = pl.BlockSpec((1, Hp), lambda i: (0, 0),
                                  pipeline_mode=pl.Buffered(1))
        else:
            w_spec = pl.BlockSpec((F, Hp), lambda i: (0, 0))
            b_spec = pl.BlockSpec((1, Hp), lambda i: (0, 0))
        return pl.pallas_call(
            _seqwise_linear_kernel,
            out_shape=jax.ShapeDtypeStruct((M, Hp), out_dtype),
            grid=grid,
            in_specs=[
                # x tile marches down the M axis (auto double-buffered DMA).
                pl.BlockSpec((TM, F), lambda i: (i, 0)),
                w_spec,
                b_spec,
            ],
            out_specs=pl.BlockSpec((TM, Hp), lambda i: (i, 0)),
            compiler_params=pltpu.CompilerParams(
                dimension_semantics=("parallel",),   # M tiles are independent
                vmem_limit_bytes=vmem_limit,
            ),
            cost_estimate=cost,
        )(x2d, w_fh, b2d)

    try:
        out2d = run(True)
    except Exception:
        # This jax build rejects pipeline_mode=Buffered(1); fall back to the
        # default double-buffered (still VMEM-resident) weight/bias.
        out2d = run(False)

    if Hp == out_features or keep_lane_padding:
        # No extra HBM pass: either there is no lane padding, or the caller
        # consumes the padded layout directly.
        return out2d.reshape(T, N, Hp)
    # Strip lane padding, then view(t, n, -1).
    return out2d[:, :out_features].reshape(T, N, out_features)


if __name__ == "__main__":
    # Small shapes consistent with SequenceWise usage: time-major (T, N, F).
    T, N, F, H = 8, 2, 32, 32

    key = jax.random.PRNGKey(0)
    kx, kw, kb = jax.random.split(key, 3)
    x = jax.random.normal(kx, (T, N, F), dtype=jnp.float32)
    weight = jax.random.normal(kw, (H, F), dtype=jnp.float32) * 0.1
    bias = jax.random.normal(kb, (H,), dtype=jnp.float32) * 0.1

    # Pure-JAX reference of the exact SequenceWise(Linear) semantics.
    ref = (x.reshape(T * N, F) @ weight.T + bias).reshape(T, N, H)

    # f32 path.
    w_fh, b2d, out_features = prepare_sequence_wise_params(weight, bias)
    out = sequence_wise_linear(x, w_fh, b2d, out_features)
    out = jax.block_until_ready(out)
    assert out.shape == (T, N, H)
    assert jnp.allclose(out, ref, atol=1e-4, rtol=1e-4)

    # bf16 streaming path (half the HBM bytes, bf16 MXU); accumulation and
    # bias add stay f32 inside the kernel.
    w_bf, b_bf, _ = prepare_sequence_wise_params(
        weight, bias, param_dtype=jnp.bfloat16)
    out_bf = sequence_wise_linear(x, w_bf, b_bf, out_features,
                                  compute_dtype=jnp.bfloat16)
    out_bf = jax.block_until_ready(out_bf)
    assert out_bf.shape == (T, N, H)
    assert jnp.allclose(out_bf.astype(jnp.float32), ref, atol=0.1, rtol=0.1)

    print("KERNEL_OK")
</pallas_src>

<mosaic_0001>
module attributes {stable_mosaic.version = 11 : i64} {
  func.func @_seqwise_linear_kernel(%arg0: i32, %arg1: memref<16x32xf32, #tpu.memory_space<vmem>>, %arg2: memref<32x128xf32, #tpu.memory_space<vmem>>, %arg3: memref<1x128xf32, #tpu.memory_space<vmem>>, %arg4: memref<16x128xf32, #tpu.memory_space<vmem>>) attributes {dimension_semantics = [#tpu.dimension_semantics<parallel>], iteration_bounds = array<i64: 1>, scalar_prefetch = 0 : i64, scratch_operands = 0 : i64, tpu.core_type = #tpu.core_type<tc>, window_params = [{transform_indices = @transform_0, window_bounds = array<i64: 16, 32>}, {pipeline_mode = #tpu.pipeline_mode<synchronous>, transform_indices = @transform_1, window_bounds = array<i64: 32, 128>}, {pipeline_mode = #tpu.pipeline_mode<synchronous>, transform_indices = @transform_2, window_bounds = array<i64: 1, 128>}, {transform_indices = @transform_3, window_bounds = array<i64: 16, 128>}]} {
    %c0 = arith.constant 0 : index
    %c0_0 = arith.constant 0 : index
    %0 = vector.load %arg1[%c0, %c0_0] : memref<16x32xf32, #tpu.memory_space<vmem>>, vector<16x32xf32>
    %c0_1 = arith.constant 0 : index
    %c0_2 = arith.constant 0 : index
    %1 = vector.load %arg2[%c0_1, %c0_2] : memref<32x128xf32, #tpu.memory_space<vmem>>, vector<32x128xf32>
    %cst = arith.constant dense<0.000000e+00> : vector<16x128xf32>
    %2 = tpu.matmul %0, %1, %cst {dimension_numbers = #tpu.dot_dimension_numbers<[1], [0], [0], [1], [0, 0, 1, 1], [], []>} : vector<16x32xf32>, vector<32x128xf32>, vector<16x128xf32> -> vector<16x128xf32>
    %c0_3 = arith.constant 0 : index
    %c0_4 = arith.constant 0 : index
    %3 = vector.load %arg3[%c0_3, %c0_4] : memref<1x128xf32, #tpu.memory_space<vmem>>, vector<1x128xf32>
    %4 = vector.broadcast %3 : vector<1x128xf32> to vector<16x128xf32>
    %5 = arith.addf %2, %4 : vector<16x128xf32>
    %c0_5 = arith.constant 0 : index
    %c0_6 = arith.constant 0 : index
    %6 = vector.load %arg4[%c0_5, %c0_6] : memref<16x128xf32, #tpu.memory_space<vmem>>, vector<16x128xf32>
    tpu.vector_store %arg4[%c0_5, %c0_6], %5 {strides = array<i32>} : memref<16x128xf32, #tpu.memory_space<vmem>>, vector<16x128xf32>,
    return
  }
  func.func @transform_0(%arg0: i32) -> (i32, i32) {
    %c0_i32 = arith.constant 0 : i32
    %c0_i32_0 = arith.constant 0 : i32
    return %arg0, %c0_i32 : i32, i32
  }
  func.func @transform_1(%arg0: i32) -> (i32, i32) {
    %c0_i32 = arith.constant 0 : i32
    %c0_i32_0 = arith.constant 0 : i32
    %c0_i32_1 = arith.constant 0 : i32
    return %c0_i32, %c0_i32_0 : i32, i32
  }
  func.func @transform_2(%arg0: i32) -> (i32, i32) {
    %c0_i32 = arith.constant 0 : i32
    %c0_i32_0 = arith.constant 0 : i32
    %c0_i32_1 = arith.constant 0 : i32
    return %c0_i32, %c0_i32_0 : i32, i32
  }
  func.func @transform_3(%arg0: i32) -> (i32, i32) {
    %c0_i32 = arith.constant 0 : i32
    %c0_i32_0 = arith.constant 0 : i32
    return %arg0, %c0_i32 : i32, i32
  }
}

module attributes {stable_mosaic.version = 11 : i64} {
  func.func @_seqwise_linear_kernel(%arg0: i32, %arg1: memref<16x32xf32, #tpu.memory_space<vmem>>, %arg2: memref<32x128xf32, #tpu.memory_space<vmem>>, %arg3: memref<1x128xf32, #tpu.memory_space<vmem>>, %arg4: memref<16x128xf32, #tpu.memory_space<vmem>>) attributes {dimension_semantics = [#tpu.dimension_semantics<parallel>], iteration_bounds = array<i64: 1>, scalar_prefetch = 0 : i64, scratch_operands = 0 : i64, tpu.core_type = #tpu.core_type<tc>, window_params = [{transform_indices = @transform_0, window_bounds = array<i64: 16, 32>}, {pipeline_mode = #tpu.pipeline_mode<synchronous>, transform_indices = @transform_1, window_bounds = array<i64: 32, 128>}, {pipeline_mode = #tpu.pipeline_mode<synchronous>, transform_indices = @transform_2, window_bounds = array<i64: 1, 128>}, {transform_indices = @transform_3, window_bounds = array<i64: 16, 128>}]} {
    %c0 = arith.constant 0 : index
    %c0_0 = arith.constant 0 : index
    %0 = vector.load %arg1[%c0, %c0_0] : memref<16x32xf32, #tpu.memory_space<vmem>>, vector<16x32xf32>
    %c0_1 = arith.constant 0 : index
    %c0_2 = arith.constant 0 : index
    %1 = vector.load %arg2[%c0_1, %c0_2] : memref<32x128xf32, #tpu.memory_space<vmem>>, vector<32x128xf32>
    %cst = arith.constant dense<0.000000e+00> : vector<16x128xf32>
    %2 = tpu.matmul %0, %1, %cst {dimension_numbers = #tpu.dot_dimension_numbers<[1], [0], [0], [1], [0, 0, 1, 1], [], []>} : vector<16x32xf32>, vector<32x128xf32>, vector<16x128xf32> -> vector<16x128xf32>
    %c0_3 = arith.constant 0 : index
    %c0_4 = arith.constant 0 : index
    %3 = vector.load %arg3[%c0_3, %c0_4] : memref<1x128xf32, #tpu.memory_space<vmem>>, vector<1x128xf32>
    %4 = vector.broadcast %3 : vector<1x128xf32> to vector<16x128xf32>
    %5 = arith.addf %2, %4 : vector<16x128xf32>
    %c0_5 = arith.constant 0 : index
    %c0_6 = arith.constant 0 : index
    %6 = vector.load %arg4[%c0_5, %c0_6] : memref<16x128xf32, #tpu.memory_space<vmem>>, vector<16x128xf32>
    tpu.vector_store %arg4[%c0_5, %c0_6], %5 {strides = array<i32>} : memref<16x128xf32, #tpu.memory_space<vmem>>, vector<16x128xf32>,
    return
  }
  func.func @transform_0(%arg0: i32) -> (i32, i32) {
    %c0_i32 = arith.constant 0 : i32
    %c0_i32_0 = arith.constant 0 : i32
    return %arg0, %c0_i32 : i32, i32
  }
  func.func @transform_1(%arg0: i32) -> (i32, i32) {
    %c0_i32 = arith.constant 0 : i32
    %c0_i32_0 = arith.constant 0 : i32
    %c0_i32_1 = arith.constant 0 : i32
    return %c0_i32, %c0_i32_0 : i32, i32
  }
  func.func @transform_2(%arg0: i32) -> (i32, i32) {
    %c0_i32 = arith.constant 0 : i32
    %c0_i32_0 = arith.constant 0 : i32
    %c0_i32_1 = arith.constant 0 : i32
    return %c0_i32, %c0_i32_0 : i32, i32
  }
  func.func @transform_3(%arg0: i32) -> (i32, i32) {
    %c0_i32 = arith.constant 0 : i32
    %c0_i32_0 = arith.constant 0 : i32
    return %arg0, %c0_i32 : i32, i32
  }
}

</mosaic_0001>

<bundles_post_ra>
// kernel: tpu_custom_call.1
= control target key start
LH: loop header
LB: loop body
LE: loop exit
PB: predicated region body
PF: predicated region fallthrough
CT: control target
= control target key end

     0   :  { %8 = vsyncpa [#allocation3], 0  ;;  %s245_s0 = inlined_call_operand.hbm [shape: f32[16,32], index: 0, kind: input, shape index: {}]   ;;  %s246_s1 = inlined_call_operand.hbm [shape: f32[32,128], index: 1, kind: input, shape index: {}]   ;;  %s247_s2 = inlined_call_operand.vmem [shape: f32[1,128], index: 2, kind: input, shape index: {}]   ;;  %s248_s3 = inlined_call_operand.hbm [shape: f32[16,128], index: 3, kind: output, shape index: {}]  }
   0x1   :  { %9 = vsyncpa [#allocation6], 0 }
   0x2   :  { %10 = vsyncpa [#allocation4], 0  ;;  %s15_s14 = sshll.u32 %s245_s0, 4  ;;  %s199_s15 = smov [#allocation2]   ;;  %s16_s14 = int_to_ptr.hbm [resolvable:$true] %s15_s14 }
   0x3   :  { %s17_s16 = sshll.u32 %s199_s15, 4  ;;  %s28_s19 = sshll.u32 %s246_s1, 4  ;;  %s18_s16 = int_to_ptr.vmem [resolvable:$true] %s17_s16  ;;  %s29_s19 = int_to_ptr.hbm [resolvable:$true] %s28_s19 }
   0x4   :  { %s200_s20 = smov 128   ;;  %s201_s21 = smov 8  }
   0x5   :  { %23 = dma.hbm_to_vmem [thread:$0]  %s16_s14, 256, %s18_s16, [#allocation3], %s200_s20, %s200_s20, %s201_s21  }
   0x6   :  { %s202_s22 = smov [#allocation5]  }
   0x7   :  { %s30_s23 = sshll.u32 %s202_s22, 4  ;;  %s31_s23 = int_to_ptr.vmem [resolvable:$true] %s30_s23 }
   0x8   :  { %36 = dma.hbm_to_vmem [thread:$0]  %s29_s19, 512, %s31_s23, [#allocation6], %s200_s20, %s200_s20, %s201_s21  }
   0x9   :  { %193 = dma.done.wait [#allocation3], 256  }
   0xa   :  { %194 = vsyncadd [#allocation3], 4294967040 }
   0xb   :  { %195 = dma.done.wait [#allocation6], 512  }
   0xc   :  { %196 = vsyncadd [#allocation6], 4294966784  ;;  %v52_v0 = vld [vmem:[#allocation5 + $0x18] sm:$0xff]  ;;  %v51_v1 = vld [vmem:[#allocation5 + $0x10] sm:$0xff]  ;;  %vm57_vm0 = vcmask 261120   ;;  %s203_s24 = smov [#allocation7]  }
   0xd   :  { %76 = vmatpush.msra.mxu0 %v52_v0  ;;  %111 = vmatpush.msra.mxu1 %v52_v0  ;;  %v50_v2 = vld [vmem:[#allocation5 + $0x8] sm:$0xff]  ;;  %v49_v3 = vld [vmem:[#allocation5] sm:$0xff]  ;;  %v47_v4 = vld [vmem:[#allocation2] sm:$0xff]  ;;  %s93_s25 = sshll.u32 %s203_s24, 4  ;;  %s95_s28 = sshll.u32 %s248_s3, 4  ;;  %s94_s25 = int_to_ptr.vmem [resolvable:$true] %s93_s25  ;;  %s96_s28 = int_to_ptr.hbm [resolvable:$true] %s95_s28 }
   0xe   :  { %v48_v5 = vld [vmem:[#allocation2 + $0x8] sm:$0xff]  ;;  %v120_v6 = vld [vmem:[%s247_s2] ss:$0 sm:$0xff] }
   0xf   :  { %77 = vmatpush.msra.mxu0 %v51_v1  ;;  %112 = vmatpush.msra.mxu1 %v51_v1 }
  0x11   :  { %78 = vmatpush.msra.mxu0 %v50_v2  ;;  %113 = vmatpush.msra.mxu1 %v50_v2 }
  0x13   :  { %79 = vmatpush.msra.mxu0 %v49_v3  ;;  %114 = vmatpush.msra.mxu1 %v49_v3 }
  0x14   :  { %109 = vmatmul.msk.f32.vlgmr.msra.gmra.mxu0 %vm57_vm0, %v47_v4  ;;  %110 = vmatmul.msk.f32.vlgmr.msra.gmra.mxu1 %vm57_vm0, %v48_v5 }
  0x91   :  { %v81_v7 = vpop.f32.mrf.mxu0  ;;  %v84_v8 = vpop.f32.mrf.mxu1 }
  0x92   :  { %v82_v9 = vadd.f32 %v120_v6, %v81_v7  ;;  %v85_v10 = vadd.f32 %v120_v6, %v84_v8 }
  0x94   :  { %87 = vst [vmem:[#allocation7] sm:$0xff] %v82_v9 }
  0x95   :  { %88 = vst [vmem:[#allocation7 + $0x8] sm:$0xff] %v85_v10 }
  0x96   :  { %101 = dma.vmem_to_hbm [thread:$0]  %s94_s25, 256, %s96_s28, [#allocation4], %s200_s20, %s200_s20, %s201_s21  }
  0x97   :  { %197 = dma.done.wait [#allocation4], 256  }
  0x98   :  { %198 = vsyncadd [#allocation4], 4294967040 }
  0x99   :  { %106 = vsyncpa [#allocation3], 1 }
  0x9a   :  { %107 = vsyncpa [#allocation6], 1 }
  0x9b   :  { %108 = vsyncpa [#allocation4], 1 }

// kernel: tpu_custom_call.1
= control target key start
LH: loop header
LB: loop body
LE: loop exit
PB: predicated region body
PF: predicated region fallthrough
CT: control target
= control target key end

     0   :  { %8 = vsyncpa [#allocation3], 0  ;;  %s245_s0 = inlined_call_operand.hbm [shape: f32[16,32], index: 0, kind: input, shape index: {}]   ;;  %s246_s1 = inlined_call_operand.hbm [shape: f32[32,128], index: 1, kind: input, shape index: {}]   ;;  %s247_s2 = inlined_call_operand.vmem [shape: f32[1,128], index: 2, kind: input, shape index: {}]   ;;  %s248_s3 = inlined_call_operand.hbm [shape: f32[16,128], index: 3, kind: output, shape index: {}]  }
   0x1   :  { %9 = vsyncpa [#allocation6], 0 }
   0x2   :  { %10 = vsyncpa [#allocation4], 0  ;;  %s15_s14 = sshll.u32 %s245_s0, 4  ;;  %s199_s15 = smov [#allocation2]   ;;  %s16_s14 = int_to_ptr.hbm [resolvable:$true] %s15_s14 }
   0x3   :  { %s17_s16 = sshll.u32 %s199_s15, 4  ;;  %s28_s19 = sshll.u32 %s246_s1, 4  ;;  %s18_s16 = int_to_ptr.vmem [resolvable:$true] %s17_s16  ;;  %s29_s19 = int_to_ptr.hbm [resolvable:$true] %s28_s19 }
   0x4   :  { %s200_s20 = smov 128   ;;  %s201_s21 = smov 8  }
   0x5   :  { %23 = dma.hbm_to_vmem [thread:$0]  %s16_s14, 256, %s18_s16, [#allocation3], %s200_s20, %s200_s20, %s201_s21  }
   0x6   :  { %s202_s22 = smov [#allocation5]  }
   0x7   :  { %s30_s23 = sshll.u32 %s202_s22, 4  ;;  %s31_s23 = int_to_ptr.vmem [resolvable:$true] %s30_s23 }
   0x8   :  { %36 = dma.hbm_to_vmem [thread:$0]  %s29_s19, 512, %s31_s23, [#allocation6], %s200_s20, %s200_s20, %s201_s21  }
   0x9   :  { %193 = dma.done.wait [#allocation3], 256  }
   0xa   :  { %194 = vsyncadd [#allocation3], 4294967040 }
   0xb   :  { %195 = dma.done.wait [#allocation6], 512  }
   0xc   :  { %196 = vsyncadd [#allocation6], 4294966784  ;;  %v52_v0 = vld [vmem:[#allocation5 + $0x18] sm:$0xff]  ;;  %v51_v1 = vld [vmem:[#allocation5 + $0x10] sm:$0xff]  ;;  %vm57_vm0 = vcmask 261120   ;;  %s203_s24 = smov [#allocation7]  }
   0xd   :  { %76 = vmatpush.msra.mxu0 %v52_v0  ;;  %111 = vmatpush.msra.mxu1 %v52_v0  ;;  %v50_v2 = vld [vmem:[#allocation5 + $0x8] sm:$0xff]  ;;  %v49_v3 = vld [vmem:[#allocation5] sm:$0xff]  ;;  %v47_v4 = vld [vmem:[#allocation2] sm:$0xff]  ;;  %s93_s25 = sshll.u32 %s203_s24, 4  ;;  %s95_s28 = sshll.u32 %s248_s3, 4  ;;  %s94_s25 = int_to_ptr.vmem [resolvable:$true] %s93_s25  ;;  %s96_s28 = int_to_ptr.hbm [resolvable:$true] %s95_s28 }
   0xe   :  { %v48_v5 = vld [vmem:[#allocation2 + $0x8] sm:$0xff]  ;;  %v120_v6 = vld [vmem:[%s247_s2] ss:$0 sm:$0xff] }
   0xf   :  { %77 = vmatpush.msra.mxu0 %v51_v1  ;;  %112 = vmatpush.msra.mxu1 %v51_v1 }
  0x11   :  { %78 = vmatpush.msra.mxu0 %v50_v2  ;;  %113 = vmatpush.msra.mxu1 %v50_v2 }
  0x13   :  { %79 = vmatpush.msra.mxu0 %v49_v3  ;;  %114 = vmatpush.msra.mxu1 %v49_v3 }
  0x14   :  { %109 = vmatmul.msk.f32.vlgmr.msra.gmra.mxu0 %vm57_vm0, %v47_v4  ;;  %110 = vmatmul.msk.f32.vlgmr.msra.gmra.mxu1 %vm57_vm0, %v48_v5 }
  0x91   :  { %v81_v7 = vpop.f32.mrf.mxu0  ;;  %v84_v8 = vpop.f32.mrf.mxu1 }
  0x92   :  { %v82_v9 = vadd.f32 %v120_v6, %v81_v7  ;;  %v85_v10 = vadd.f32 %v120_v6, %v84_v8 }
  0x94   :  { %87 = vst [vmem:[#allocation7] sm:$0xff] %v82_v9 }
  0x95   :  { %88 = vst [vmem:[#allocation7 + $0x8] sm:$0xff] %v85_v10 }
  0x96   :  { %101 = dma.vmem_to_hbm [thread:$0]  %s94_s25, 256, %s96_s28, [#allocation4], %s200_s20, %s200_s20, %s201_s21  }
  0x97   :  { %197 = dma.done.wait [#allocation4], 256  }
  0x98   :  { %198 = vsyncadd [#allocation4], 4294967040 }
  0x99   :  { %106 = vsyncpa [#allocation3], 1 }
  0x9a   :  { %107 = vsyncpa [#allocation6], 1 }
  0x9b   :  { %108 = vsyncpa [#allocation4], 1 }

</bundles_post_ra>
